<compile_context>
chip_gen: v7x
topology: tpu7x:2x2x1
jax: 0.10.0
libtpu: 0.0.40
codegen_flags: <defaults>
</compile_context>

<pallas_src>
import functools

import jax
import jax.numpy as jnp
from jax.experimental import pallas as pl
from jax.experimental.pallas import tpu as pltpu

ALPHA = 2
BETA = 4

LANES = 128
SUBLANES = 8
MAX_BLOCK_ROWS = 1024  # 1024 x 128 x 4B = 512 KiB per f32 input block


def _round_up(x, m):
    return ((x + m - 1) // m) * m


def _int_pow(x, n):
    """x**n via repeated multiplies (VPU) for small non-negative integer n."""
    if not isinstance(n, int) or n < 0:
        return jnp.power(x, jnp.float32(n))  # fallback: EUP path
    if n == 0:
        return jnp.ones_like(x)
    result = None
    base = x
    while n > 0:
        if n & 1:
            result = base if result is None else result * base
        n >>= 1
        if n:
            base = base * base
    return result


def _focal_kernel(pred_ref, tgt_ref, loss_ref, npos_ref,
                  acc_loss, acc_npos, *, alpha, beta):
    i = pl.program_id(0)

    @pl.when(i == 0)
    def _():
        acc_loss[...] = jnp.zeros_like(acc_loss)
        acc_npos[...] = jnp.zeros_like(acc_npos)

    p = pred_ref[...].astype(jnp.float32)
    t = tgt_ref[...].astype(jnp.float32)

    pos = t == 1.0
    pos_f = pos.astype(jnp.float32)

    # q = p at positives, (1-p) at negatives -> single log per element.
    q = jnp.where(pos, p, 1.0 - p)
    # (1-q)^alpha == (1-p)^alpha at positives, p^alpha at negatives.
    base_w = _int_pow(1.0 - q, alpha)
    # (1-t)^beta is exactly 0 at positives, so (+ pos_f) selects 1 there.
    neg_w = _int_pow(1.0 - t, beta) + pos_f

    # per-lane accumulation; cross-lane reduce deferred to the final step
    acc_loss[...] += jnp.log(q) * base_w * neg_w
    acc_npos[...] += pos_f

    @pl.when(i == pl.num_programs(0) - 1)
    def _():
        loss_ref[...] = jnp.reshape(-jnp.sum(acc_loss[...]), (1, 1))
        npos_ref[...] = jnp.reshape(
            jnp.sum(acc_npos[...]), (1, 1)).astype(jnp.int32)


def focal_loss_v2(prediction, target, alpha=ALPHA, beta=BETA):
    """Returns (loss: f32 scalar, num_positive: i32 scalar)."""
    pred_flat = prediction.reshape(-1)
    tgt_flat = target.reshape(-1)
    n = pred_flat.shape[0]

    rows = pl.cdiv(n, LANES)
    if rows <= MAX_BLOCK_ROWS:
        block_rows = _round_up(rows, SUBLANES)
        rows_padded = block_rows            # single grid step
    else:
        block_rows = MAX_BLOCK_ROWS
        rows_padded = _round_up(rows, block_rows)

    pad = rows_padded * LANES - n
    if pad:
        # pad with pred=0, target=0 -> q=1 (log=0), weight=0, never a positive.
        pred_flat = jnp.pad(pred_flat, (0, pad))
        tgt_flat = jnp.pad(tgt_flat, (0, pad))

    pred2d = pred_flat.reshape(rows_padded, LANES)
    tgt2d = tgt_flat.reshape(rows_padded, LANES)
    grid = (rows_padded // block_rows,)

    kernel = functools.partial(_focal_kernel, alpha=alpha, beta=beta)

    loss, npos = pl.pallas_call(
        kernel,
        out_shape=(
            jax.ShapeDtypeStruct((1, 1), jnp.float32),
            jax.ShapeDtypeStruct((1, 1), jnp.int32),
        ),
        grid_spec=pltpu.PrefetchScalarGridSpec(
            num_scalar_prefetch=0,
            grid=grid,
            in_specs=[
                pl.BlockSpec((block_rows, LANES), lambda i: (i, 0)),
                pl.BlockSpec((block_rows, LANES), lambda i: (i, 0)),
            ],
            out_specs=(
                pl.BlockSpec((1, 1), lambda i: (0, 0)),
                pl.BlockSpec((1, 1), lambda i: (0, 0)),
            ),
            scratch_shapes=[
                pltpu.VMEM((block_rows, LANES), jnp.float32),  # loss partials
                pltpu.VMEM((block_rows, LANES), jnp.float32),  # n_pos partials
            ],
        ),
        compiler_params=pltpu.CompilerParams(
            dimension_semantics=("arbitrary",),
        ),
    )(pred2d, tgt2d)

    # TODO(synk): for very large inputs on v7x, add a leading "parallel" grid
    # axis of size 2 (per-TensorCore partials summed in the wrapper) so both
    # TensorCores share the HBM streaming work.
    return loss[0, 0], npos[0, 0]


def _reference(prediction, target, alpha=ALPHA, beta=BETA):
    p = prediction.astype(jnp.float32)
    t = target.astype(jnp.float32)
    idx = t == 1.0
    pos_l = jnp.log(p) * jnp.power(1.0 - p, float(alpha))
    neg_l = jnp.log(1.0 - p) * jnp.power(p, float(alpha)) * jnp.power(1.0 - t, float(beta))
    pos_sum = jnp.sum(jnp.where(idx, pos_l, 0.0))
    neg_sum = jnp.sum(jnp.where(idx, 0.0, neg_l))
    return -(neg_sum + pos_sum), jnp.sum(idx.astype(jnp.int32))


if __name__ == "__main__":
    key = jax.random.PRNGKey(0)
    k_pred, k_tgt, k_pos = jax.random.split(key, 3)

    N, C, H, W = 2, 4, 16, 16  # NCHW, same as the PyTorch module's inputs
    prediction = jax.random.uniform(
        k_pred, (N, C, H, W), dtype=jnp.float32, minval=0.01, maxval=0.99
    )
    # target: heatmap-like values in [0, 0.9] with a few exact 1.0 "peaks"
    target = jax.random.uniform(k_tgt, (N, C, H, W), dtype=jnp.float32, maxval=0.9)
    peak_mask = jax.random.uniform(k_pos, (N, C, H, W)) < 0.02
    target = jnp.where(peak_mask, jnp.float32(1.0), target)

    loss, num_positive = focal_loss_v2(prediction, target)
    loss = jax.block_until_ready(loss)
    num_positive = jax.block_until_ready(num_positive)

    ref_loss, ref_npos = _reference(prediction, target)
    assert int(num_positive) == int(ref_npos), (num_positive, ref_npos)
    assert jnp.allclose(loss, ref_loss, rtol=1e-4, atol=1e-3), (loss, ref_loss)

    print("KERNEL_OK")
</pallas_src>

<mosaic_0001>
module attributes {stable_mosaic.version = 11 : i64} {
  func.func @_focal_kernel(%arg0: i32, %arg1: memref<16x128xf32, #tpu.memory_space<vmem>>, %arg2: memref<16x128xf32, #tpu.memory_space<vmem>>, %arg3: memref<1x1xf32, #tpu.memory_space<vmem>>, %arg4: memref<1x1xi32, #tpu.memory_space<vmem>>, %arg5: memref<16x128xf32, #tpu.memory_space<vmem>>, %arg6: memref<16x128xf32, #tpu.memory_space<vmem>>) attributes {dimension_semantics = [#tpu.dimension_semantics<arbitrary>], iteration_bounds = array<i64: 1>, scalar_prefetch = 0 : i64, scratch_operands = 2 : i64, tpu.core_type = #tpu.core_type<tc>, window_params = [{transform_indices = @transform_0, window_bounds = array<i64: 16, 128>}, {transform_indices = @transform_1, window_bounds = array<i64: 16, 128>}, {pipeline_mode = #tpu.pipeline_mode<synchronous>, transform_indices = @transform_2, window_bounds = array<i64: 1, 1>}, {pipeline_mode = #tpu.pipeline_mode<synchronous>, transform_indices = @transform_3, window_bounds = array<i64: 1, 1>}]} {
    %c0_i32 = arith.constant 0 : i32
    %0 = arith.cmpi eq, %arg0, %c0_i32 : i32
    %1 = arith.extui %0 : i1 to i32
    %c0_i32_0 = arith.constant 0 : i32
    %2 = arith.cmpi ne, %1, %c0_i32_0 : i32
    scf.if %2 {
      %cst_17 = arith.constant 0.000000e+00 : f32
      %32 = vector.broadcast %cst_17 : f32 to vector<16x128xf32>
      %c0_18 = arith.constant 0 : index
      %c0_19 = arith.constant 0 : index
      %33 = vector.load %arg5[%c0_18, %c0_19] : memref<16x128xf32, #tpu.memory_space<vmem>>, vector<16x128xf32>
      tpu.vector_store %arg5[%c0_18, %c0_19], %32 {strides = array<i32>} : memref<16x128xf32, #tpu.memory_space<vmem>>, vector<16x128xf32>,
      %cst_20 = arith.constant 0.000000e+00 : f32
      %34 = vector.broadcast %cst_20 : f32 to vector<16x128xf32>
      %c0_21 = arith.constant 0 : index
      %c0_22 = arith.constant 0 : index
      %35 = vector.load %arg6[%c0_21, %c0_22] : memref<16x128xf32, #tpu.memory_space<vmem>>, vector<16x128xf32>
      tpu.vector_store %arg6[%c0_21, %c0_22], %34 {strides = array<i32>} : memref<16x128xf32, #tpu.memory_space<vmem>>, vector<16x128xf32>,
    } else {
    }
    %c0 = arith.constant 0 : index
    %c0_1 = arith.constant 0 : index
    %3 = vector.load %arg1[%c0, %c0_1] : memref<16x128xf32, #tpu.memory_space<vmem>>, vector<16x128xf32>
    %c0_2 = arith.constant 0 : index
    %c0_3 = arith.constant 0 : index
    %4 = vector.load %arg2[%c0_2, %c0_3] : memref<16x128xf32, #tpu.memory_space<vmem>>, vector<16x128xf32>
    %cst = arith.constant 1.000000e+00 : f32
    %5 = vector.broadcast %cst : f32 to vector<16x128xf32>
    %6 = arith.cmpf oeq, %4, %5 : vector<16x128xf32>
    %7 = arith.extui %6 : vector<16x128xi1> to vector<16x128xi32>
    %8 = arith.sitofp %7 : vector<16x128xi32> to vector<16x128xf32>
    %cst_4 = arith.constant 1.000000e+00 : f32
    %9 = vector.broadcast %cst_4 : f32 to vector<16x128xf32>
    %10 = arith.subf %9, %3 : vector<16x128xf32>
    %11 = arith.select %6, %3, %10 : vector<16x128xi1>, vector<16x128xf32>
    %cst_5 = arith.constant 1.000000e+00 : f32
    %12 = vector.broadcast %cst_5 : f32 to vector<16x128xf32>
    %13 = arith.subf %12, %11 : vector<16x128xf32>
    %14 = arith.mulf %13, %13 : vector<16x128xf32>
    %cst_6 = arith.constant 1.000000e+00 : f32
    %15 = vector.broadcast %cst_6 : f32 to vector<16x128xf32>
    %16 = arith.subf %15, %4 : vector<16x128xf32>
    %17 = arith.mulf %16, %16 : vector<16x128xf32>
    %18 = arith.mulf %17, %17 : vector<16x128xf32>
    %19 = arith.addf %18, %8 : vector<16x128xf32>
    %c0_7 = arith.constant 0 : index
    %c0_8 = arith.constant 0 : index
    %20 = vector.load %arg5[%c0_7, %c0_8] : memref<16x128xf32, #tpu.memory_space<vmem>>, vector<16x128xf32>
    %21 = math.log %11 : vector<16x128xf32>
    %22 = arith.mulf %21, %14 : vector<16x128xf32>
    %23 = arith.mulf %22, %19 : vector<16x128xf32>
    %24 = arith.addf %20, %23 : vector<16x128xf32>
    %c0_9 = arith.constant 0 : index
    %c0_10 = arith.constant 0 : index
    %25 = vector.load %arg5[%c0_9, %c0_10] : memref<16x128xf32, #tpu.memory_space<vmem>>, vector<16x128xf32>
    tpu.vector_store %arg5[%c0_9, %c0_10], %24 {strides = array<i32>} : memref<16x128xf32, #tpu.memory_space<vmem>>, vector<16x128xf32>,
    %c0_11 = arith.constant 0 : index
    %c0_12 = arith.constant 0 : index
    %26 = vector.load %arg6[%c0_11, %c0_12] : memref<16x128xf32, #tpu.memory_space<vmem>>, vector<16x128xf32>
    %27 = arith.addf %26, %8 : vector<16x128xf32>
    %c0_13 = arith.constant 0 : index
    %c0_14 = arith.constant 0 : index
    %28 = vector.load %arg6[%c0_13, %c0_14] : memref<16x128xf32, #tpu.memory_space<vmem>>, vector<16x128xf32>
    tpu.vector_store %arg6[%c0_13, %c0_14], %27 {strides = array<i32>} : memref<16x128xf32, #tpu.memory_space<vmem>>, vector<16x128xf32>,
    %c0_i32_15 = arith.constant 0 : i32
    %29 = arith.cmpi eq, %arg0, %c0_i32_15 : i32
    %30 = arith.extui %29 : i1 to i32
    %c0_i32_16 = arith.constant 0 : i32
    %31 = arith.cmpi ne, %30, %c0_i32_16 : i32
    scf.if %31 {
      %c0_17 = arith.constant 0 : index
      %c0_18 = arith.constant 0 : index
      %32 = vector.load %arg5[%c0_17, %c0_18] : memref<16x128xf32, #tpu.memory_space<vmem>>, vector<16x128xf32>
      %33 = vector.shape_cast %32 : vector<16x128xf32> to vector<1x16x128xf32>
      %cst_19 = arith.constant dense<0.000000e+00> : vector<1xf32>
      %34 = vector.multi_reduction <add>, %33, %cst_19 [1, 2] : vector<1x16x128xf32> to vector<1xf32>
      %35 = vector.shape_cast %34 : vector<1xf32> to vector<1x1x1xf32>
      %36 = vector.extract %35[0, 0, 0] : f32 from vector<1x1x1xf32>
      %cst_20 = arith.constant 0.000000e+00 : f32
      %37 = arith.subf %cst_20, %36 : f32
      %38 = vector.broadcast %37 : f32 to vector<1x1xf32>
      %c0_21 = arith.constant 0 : index
      %c0_22 = arith.constant 0 : index
      %39 = vector.load %arg3[%c0_21, %c0_22] : memref<1x1xf32, #tpu.memory_space<vmem>>, vector<1x1xf32>
      tpu.vector_store %arg3[%c0_21, %c0_22], %38 {strides = array<i32>} : memref<1x1xf32, #tpu.memory_space<vmem>>, vector<1x1xf32>,
      %c0_23 = arith.constant 0 : index
      %c0_24 = arith.constant 0 : index
      %40 = vector.load %arg6[%c0_23, %c0_24] : memref<16x128xf32, #tpu.memory_space<vmem>>, vector<16x128xf32>
      %41 = vector.shape_cast %40 : vector<16x128xf32> to vector<1x16x128xf32>
      %cst_25 = arith.constant dense<0.000000e+00> : vector<1xf32>
      %42 = vector.multi_reduction <add>, %41, %cst_25 [1, 2] : vector<1x16x128xf32> to vector<1xf32>
      %43 = vector.shape_cast %42 : vector<1xf32> to vector<1x1x1xf32>
      %44 = vector.extract %43[0, 0, 0] : f32 from vector<1x1x1xf32>
      %45 = vector.broadcast %44 : f32 to vector<1x1xf32>
      %46 = arith.fptosi %45 : vector<1x1xf32> to vector<1x1xi32>
      %c0_26 = arith.constant 0 : index
      %c0_27 = arith.constant 0 : index
      %47 = vector.load %arg4[%c0_26, %c0_27] : memref<1x1xi32, #tpu.memory_space<vmem>>, vector<1x1xi32>
      tpu.vector_store %arg4[%c0_26, %c0_27], %46 {strides = array<i32>} : memref<1x1xi32, #tpu.memory_space<vmem>>, vector<1x1xi32>,
    } else {
    }
    return
  }
  func.func @transform_0(%arg0: i32) -> (i32, i32) {
    %c0_i32 = arith.constant 0 : i32
    %c0_i32_0 = arith.constant 0 : i32
    return %arg0, %c0_i32 : i32, i32
  }
  func.func @transform_1(%arg0: i32) -> (i32, i32) {
    %c0_i32 = arith.constant 0 : i32
    %c0_i32_0 = arith.constant 0 : i32
    return %arg0, %c0_i32 : i32, i32
  }
  func.func @transform_2(%arg0: i32) -> (i32, i32) {
    %c0_i32 = arith.constant 0 : i32
    %c0_i32_0 = arith.constant 0 : i32
    %c0_i32_1 = arith.constant 0 : i32
    return %c0_i32, %c0_i32_0 : i32, i32
  }
  func.func @transform_3(%arg0: i32) -> (i32, i32) {
    %c0_i32 = arith.constant 0 : i32
    %c0_i32_0 = arith.constant 0 : i32
    %c0_i32_1 = arith.constant 0 : i32
    return %c0_i32, %c0_i32_0 : i32, i32
  }
}

</mosaic_0001>

<bundles_post_ra>
// kernel: tpu_custom_call.1
= control target key start
LH: loop header
LB: loop body
LE: loop exit
PB: predicated region body
PF: predicated region fallthrough
CT: control target
= control target key end

     0   :  { %9 = vsyncpa [#allocation5], 0  ;;  %s355_s0 = inlined_call_operand.hbm [shape: f32[16,128], index: 0, kind: input, shape index: {}]   ;;  %s356_s1 = inlined_call_operand.hbm [shape: f32[16,128], index: 1, kind: input, shape index: {}]   ;;  %s357_s2 = inlined_call_operand.hbm [shape: f32[1,1], index: 2, kind: output, shape index: {0}]   ;;  %s358_s3 = inlined_call_operand.hbm [shape: s32[1,1], index: 3, kind: output, shape index: {1}]  }
   0x1   :  { %10 = vsyncpa [#allocation8], 0 }
   0x2   :  { %11 = vsyncpa [#allocation6], 0 }
   0x3   :  { %12 = vsyncpa [#allocation11], 0  ;;  %s276_s12 = smov [#allocation4]   ;;  %s180_s16 = scalar_lea.hbm %s355_s0, 256 }
   0x4   :  { %s18_s13 = sshll.u32 %s276_s12, 4  ;;  %p181_p0 = scmp.ne.s32.totalorder %s355_s0, %s180_s16  ;;  %s19_s13 = int_to_ptr.vmem [resolvable:$true] %s18_s13 }
   0x5   :  { %p184_p1 = scmp.lt.u32.totalorder %s180_s16, %s355_s0 }
   0x7   :  { %p186_p2 = pnand %p184_p1, %p181_p0 }
   0x9   :  { %189 = shalt.err (!%p186_p2)
}
   0xa   :  { %s190_s21 = scalar_lea.vmem %s19_s13, 256  ;;  %p195_p4 = scmp.lt.s32.totalorder %s19_s13, %s19_s13 }
   0xb   :  { %p191_p3 = scmp.ne.s32.totalorder %s19_s13, %s190_s21  ;;  %p196_p5 = scmp.lt.s32.totalorder %s190_s21, %s190_s21 }
   0xd   :  { %p197_p6 = por %p196_p5, %p195_p4 }
   0xf   :  { %p198_p7 = pnand %p197_p6, %p191_p3 }
  0x11   :  { %201 = shalt.err (!%p198_p7)
}
  0x12   :  { %s277_s22 = smov 128   ;;  %s278_s23 = smov 8  }
  0x13   :  { %24 = dma.hbm_to_vmem [thread:$0]  %s355_s0, 256, %s19_s13, [#allocation5], %s277_s22, %s277_s22, %s278_s23  }
  0x14   :  { %s279_s26 = smov [#allocation7]   ;;  %s202_s30 = scalar_lea.hbm %s356_s1, 256 }
  0x15   :  { %s30_s27 = sshll.u32 %s279_s26, 4  ;;  %p203_p8 = scmp.ne.s32.totalorder %s356_s1, %s202_s30  ;;  %s31_s27 = int_to_ptr.vmem [resolvable:$true] %s30_s27 }
  0x16   :  { %p206_p9 = scmp.lt.u32.totalorder %s202_s30, %s356_s1 }
  0x18   :  { %p208_p10 = pnand %p206_p9, %p203_p8 }
  0x1a   :  { %211 = shalt.err (!%p208_p10)
}
  0x1b   :  { %s212_s8 = scalar_lea.vmem %s31_s27, 256  ;;  %p217_p12 = scmp.lt.s32.totalorder %s31_s27, %s31_s27 }
  0x1c   :  { %p213_p11 = scmp.ne.s32.totalorder %s31_s27, %s212_s8  ;;  %p218_p13 = scmp.lt.s32.totalorder %s212_s8, %s212_s8 }
  0x1e   :  { %p219_p0 = por %p218_p13, %p217_p12 }
  0x20   :  { %p220_p1 = pnand %p219_p0, %p213_p11 }
  0x22   :  { %223 = shalt.err (!%p220_p1)
}
  0x23   :  { %36 = dma.hbm_to_vmem [thread:$0]  %s356_s1, 256, %s31_s27, [#allocation8], %s277_s22, %s277_s22, %s278_s23  }
  0x24   :  { %268 = dma.done.wait [#allocation5], 256  }
  0x25   :  { %269 = vsyncadd [#allocation5], 4294967040 }
  0x26   :  { %270 = dma.done.wait [#allocation8], 256  }
  0x27   :  { %271 = vsyncadd [#allocation8], 4294967040  ;;  %v51_v0 = vld [vmem:[#allocation4] sm:$0xff]  ;;  %v52_v1 = vld [vmem:[#allocation4 + $0x8] sm:$0xff]  ;;  %v280_v15 = vmov 0.0   ;;  %s281_s1 = smov [#allocation9]  }
  0x28   :  { %v53_v2 = vld [vmem:[#allocation7] sm:$0xff]  ;;  %v54_v3 = vld [vmem:[#allocation7 + $0x8] sm:$0xff]  ;;  %v61_v4 = vsub.f32 1.0, %v51_v0  ;;  %v62_v5 = vsub.f32 1.0, %v52_v1  ;;  %s137_s10 = sshll.u32 %s281_s1, 4  ;;  %vm114_vm2 = vcmask 0   ;;  %s138_s10 = int_to_ptr.vmem [resolvable:$true] %s137_s10 }
  0x29   :  { %vm55_vm0 = vcmp.eq.f32.partialorder %v53_v2, 1.0  ;;  %vm56_vm1 = vcmp.eq.f32.partialorder %v54_v3, 1.0  ;;  %v69_v8 = vsub.f32 1.0, %v53_v2  ;;  %v70_v9 = vsub.f32 1.0, %v54_v3  ;;  %s282_s14 = smov [#allocation10]   ;;  %s224_s16 = scalar_lea.vmem %s138_s10, 16 }
  0x2a   :  { %v63_v6 = vsel %vm55_vm0, %v51_v0, %v61_v4  ;;  %v64_v7 = vsel %vm56_vm1, %v52_v1, %v62_v5  ;;  %v161_v16 = vsel %vm55_vm0, 1.0, %v280_v15  ;;  %v162_v18 = vsel %vm56_vm1, 1.0, %v280_v15  ;;  %s147_s15 = sshll.u32 %s282_s14, 4  ;;  %p225_p2 = scmp.ne.s32.totalorder %s138_s10, %s224_s16  ;;  %s148_s15 = int_to_ptr.vmem [resolvable:$true] %s147_s15 }
  0x2b   :  { %176 = vlog2.f32 %v63_v6  ;;  %v71_v10 = vmul.f32 %v69_v8, %v69_v8  ;;  %v72_v11 = vmul.f32 %v70_v9, %v70_v9  ;;  %v65_v12 = vsub.f32 1.0, %v63_v6  ;;  %s228_s17 = scalar_lea.vmem %s138_s10, 32  ;;  %p229_p3 = scmp.lt.s32.totalorder %s138_s10, %s138_s10 }
  0x2c   :  { %178 = vlog2.f32 %v64_v7  ;;  %v66_v13 = vsub.f32 1.0, %v64_v7  ;;  %v118_v32 = vadd.f32 %v162_v18, %v161_v16  ;;  %p230_p4 = scmp.lt.s32.totalorder %s228_s17, %s224_s16 }
  0x2d   :  { %v73_v14 = vmul.f32 %v71_v10, %v71_v10  ;;  %v74_v17 = vmul.f32 %v72_v11, %v72_v11  ;;  %v67_v19 = vmul.f32 %v65_v12, %v65_v12 }
  0x2e   :  { %v68_v21 = vmul.f32 %v66_v13, %v66_v13  ;;  %p231_p5 = por %p230_p4, %p229_p3 }
  0x2f   :  { %v75_v23 = vadd.f32 %v161_v16, %v73_v14  ;;  %v76_v25 = vadd.f32 %v162_v18, %v74_v17 }
  0x30   :  { %p232_p6 = pnand %p231_p5, %p225_p2 }
  0x35   :  { %v177_v20 = vpop.eup %176 }
  0x36   :  { %v179_v22 = vpop.eup %178  ;;  %v80_v24 = vmul.f32 0.6931472, %v177_v20 }
  0x37   :  { %v82_v26 = vmul.f32 0.6931472, %v179_v22 }
  0x38   :  { %v83_v27 = vmul.f32 %v80_v24, %v67_v19 }
  0x39   :  { %v84_v28 = vmul.f32 %v82_v26, %v68_v21 }
  0x3a   :  { %v85_v29 = vmul.f32 %v83_v27, %v75_v23 }
  0x3b   :  { %v86_v30 = vmul.f32 %v84_v28, %v76_v25 }
  0x3d   :  { %v102_v31 = vadd.f32 %v86_v30, %v85_v29 }
  0x3f   :  { %103 = vadd.xlane.f32.xlu0 %v102_v31 }
  0x43   :  { %119 = vadd.xlane.f32.xlu0 %v118_v32 }
  0xcc   :  { %v104_v33 = vpop.xlane.xlu0 %103 }
  0xcd   :  { %v105_v34 = vrot.slane %v104_v33, 4 }
  0xcf   :  { %v106_v35 = vadd.f32 %v105_v34, %v104_v33 }
  0xd0   :  { %v120_v36 = vpop.xlane.xlu0 %119 }
  0xd1   :  { %v107_v37 = vrot.slane %v106_v35, 2  ;;  %v121_v38 = vrot.slane %v120_v36, 4 }
  0xd3   :  { %v122_v39 = vadd.f32 %v121_v38, %v120_v36  ;;  %v108_v40 = vadd.f32 %v107_v37, %v106_v35 }
  0xd5   :  { %v123_v41 = vrot.slane %v122_v39, 2  ;;  %v109_v42 = vrot.slane %v108_v40, 1 }
  0xd7   :  { %v124_v43 = vadd.f32 %v123_v41, %v122_v39  ;;  %v110_v44 = vadd.f32 %v109_v42, %v108_v40 }
  0xd9   :  { %163 = vpush %v110_v44  ;;  %v125_v45 = vrot.slane %v124_v43, 1 }
  0xdb   :  { %v126_v46 = vadd.f32 %v125_v45, %v124_v43 }
  0xdd   :  { %165 = vpush %v126_v46 }
 0x10a   :  { %s164_s11 = spop %163 }
 0x10b   :  { %s112_s12 = ssub.f32 0.0, %s164_s11 }
 0x10d   :  { %v113_v47 = vstv %s112_s12 }
 0x10e   :  { %s166_s13 = spop %165  ;;  %115 = vst.msk [vmem:[#allocation9] sm:$0x1] %vm114_vm2, %v113_v47 }
 0x10f   :  { %v128_v48 = vstv %s166_s13 }
 0x110   :  { %235 = shalt.err (!%p232_p6)
}
 0x111   :  { %s236_s20 = scalar_lea.hbm %s357_s2, 16 }
 0x112   :  { %p237_p7 = scmp.ne.s32.totalorder %s357_s2, %s236_s20  ;;  %p240_p8 = scmp.lt.u32.totalorder %s236_s20, %s357_s2 }
 0x114   :  { %p242_p9 = pnand %p240_p8, %p237_p7 }
 0x116   :  { %245 = shalt.err (!%p242_p9)
}
 0x117   :  { %140 = dma.vmem_to_hbm [thread:$0]  %s138_s10, 16, %s357_s2, [#allocation6]   ;;  %v167_v49 = vtrunc.f32 %v128_v48 }
 0x118   :  { %s246_s27 = scalar_lea.vmem %s148_s15, 16  ;;  %s250_s28 = scalar_lea.vmem %s148_s15, 32 }
 0x119   :  { %v168_v50 = vcvt.f32.s32 %v167_v49  ;;  %p247_p10 = scmp.ne.s32.totalorder %s148_s15, %s246_s27  ;;  %p251_p11 = scmp.lt.s32.totalorder %s148_s15, %s148_s15 }
 0x11a   :  { %p252_p12 = scmp.lt.s32.totalorder %s250_s28, %s246_s27 }
 0x11b   :  { %130 = vst.msk [vmem:[#allocation10] sm:$0x1] %vm114_vm2, %v168_v50 }
 0x11c   :  { %p253_p13 = por %p252_p12, %p251_p11 }
 0x11e   :  { %p254_p0 = pnand %p253_p13, %p247_p10 }
 0x120   :  { %257 = shalt.err (!%p254_p0)
}
 0x121   :  { %s258_s4 = scalar_lea.hbm %s358_s3, 16 }
 0x122   :  { %p259_p1 = scmp.ne.s32.totalorder %s358_s3, %s258_s4  ;;  %p262_p2 = scmp.lt.u32.totalorder %s258_s4, %s358_s3 }
 0x124   :  { %p264_p3 = pnand %p262_p2, %p259_p1 }
 0x126   :  { %267 = shalt.err (!%p264_p3)
}
 0x127   :  { %150 = dma.vmem_to_hbm [thread:$0]  %s148_s15, 16, %s358_s3, [#allocation11]  }
 0x128   :  { %272 = dma.done.wait [#allocation6], 16  }
 0x129   :  { %273 = vsyncadd [#allocation6], 4294967280 }
 0x12a   :  { %274 = dma.done.wait [#allocation11], 16  }
 0x12b   :  { %275 = vsyncadd [#allocation11], 4294967280 }
 0x12c   :  { %157 = vsyncpa [#allocation5], 1 }
 0x12d   :  { %158 = vsyncpa [#allocation8], 1 }
 0x12e   :  { %159 = vsyncpa [#allocation6], 1 }
 0x12f   :  { %160 = vsyncpa [#allocation11], 1 }

</bundles_post_ra>
